<compile_context>
chip_gen: v7x
topology: tpu7x:2x2x1
jax: 0.10.0
libtpu: 0.0.40
codegen_flags: <defaults>
</compile_context>

<pallas_src>
import functools

import jax
import jax.numpy as jnp
from jax.experimental import pallas as pl
from jax.experimental.pallas import tpu as pltpu


def _sublane_multiple(dtype) -> int:
    """Minimum second-minor tile multiple for a dtype (8 f32 / 16 bf16 / 32 i8)."""
    return max(8, 32 // jnp.dtype(dtype).itemsize)


def _vmem_limit_bytes() -> int:
    """Per-generation scoped-VMEM limit (~3/4 of physical, capped at 96 MiB)."""
    try:
        cap = int(pltpu.get_tpu_info().vmem_capacity_bytes)
    except Exception:
        cap = 64 * 1024 * 1024          # conservative fallback (v7x-sized VMEM)
    return max(16 * 1024 * 1024, min((cap * 3) // 4, 96 * 1024 * 1024))


def summary_kernel(b_ref, xo_ref, xn_ref, wo_ref, wn_ref, acc_ref, den_ref, *,
                   batch, tile_b, inner, ragged, use_mxu_for_acc):
    c = pl.program_id(0)        # batch partition (parallel; megacore split on v7x)
    i = pl.program_id(1)        # streaming reduction step (arbitrary)

    @pl.when(i == 0)
    def _init():
        acc_ref[...] = jnp.zeros_like(acc_ref)
        den_ref[...] = jnp.zeros_like(den_ref)

    xo = xo_ref[...].astype(jnp.float32)             # (tile_b, ino)
    xn = xn_ref[...].astype(jnp.float32)             # (tile_b, inn)
    wo = wo_ref[...].astype(jnp.float32)             # (1, ino)
    wn = wn_ref[...].astype(jnp.float32)             # (1, inn)

    # Linear(cat(xo, xn)) == per-row dot with the split weight row vectors:
    # VPU multiply + lane reduce, no transposes, no concat.
    s = (jnp.sum(xo * wo, axis=-1, keepdims=True)
         + jnp.sum(xn * wn, axis=-1, keepdims=True)
         + b_ref[0, 0])                              # (tile_b, 1)

    # tanh bounds the logits to [-1, 1] => exp in [1/e, e]; no max-subtract.
    e = jnp.exp(jnp.tanh(s))                         # (tile_b, 1)

    def _accumulate(e_v, xn_v):
        den_ref[...] += jnp.sum(e_v, axis=0, keepdims=True)            # (1, 1)
        if use_mxu_for_acc:
            # v7x: VALU approaches saturation at 3.2 TB/s HBM; the MXU is idle,
            # so contract e·xn there (over the batch axis, no transpose).
            acc_ref[...] += jax.lax.dot_general(
                e_v, xn_v, (((0,), (0,)), ((), ())),
                preferred_element_type=jnp.float32)                    # (1, inn)
        else:
            # v5e/v6e default: VALU has >=3x slack, keep the VPU path.
            acc_ref[...] += jnp.sum(e_v * xn_v, axis=0, keepdims=True)  # (1, inn)

    if ragged:
        # Only blocks that overlap the batch end pay for the masking; the hot
        # full blocks take the unmasked branch (no iota / compare / where).
        row_start = (c * inner + i) * tile_b

        @pl.when(row_start + tile_b <= batch)
        def _full():
            _accumulate(e, xn)

        @pl.when(row_start + tile_b > batch)
        def _masked():
            rows = jax.lax.broadcasted_iota(jnp.int32, (tile_b, 1), 0) + row_start
            valid = rows < batch
            # Mask BOTH factors: the pad region is stale VMEM and may hold
            # NaN/Inf; 0 * NaN would otherwise poison the accumulator.
            _accumulate(jnp.where(valid, e, 0.0), jnp.where(valid, xn, 0.0))
    else:
        _accumulate(e, xn)


def summary_forward(xo, xn, weight, bias, *, tile_b_cap=2048, use_mxu_for_acc=False):
    """xo: (B, ino), xn: (B, inn), weight: (1, ino+inn), bias: (1,) -> (inn,)."""
    B, ino = xo.shape
    Bn, inn = xn.shape
    assert B == Bn, (B, Bn)

    vmem_limit = _vmem_limit_bytes()

    # ---- tile_b from a VMEM budget (double-buffered inputs + f32 temporaries).
    bytes_xo = jnp.dtype(xo.dtype).itemsize
    bytes_xn = jnp.dtype(xn.dtype).itemsize
    per_row = (2 * (ino * bytes_xo + inn * bytes_xn)   # 2x-buffered input tiles
               + 4 * (ino + 3 * inn))                  # f32 upcasts + temporaries
    tile_budget = vmem_limit // 2                      # headroom for compiler scratch
    tile_b = min(B, max(1, tile_budget // per_row), tile_b_cap)

    sub = max(_sublane_multiple(xo.dtype), _sublane_multiple(xn.dtype))
    if tile_b < B:
        # Tiled blocks need a dtype-aware sublane multiple (8 / 16 / 32).
        tile_b = max(sub, (tile_b // sub) * sub)

    grid_b = pl.cdiv(B, tile_b)
    ragged = (grid_b * tile_b != B)

    # Leading "parallel" axis: 2-way batch split -> per-core partial sums on a
    # v7x megacore; degenerates to a serial loop (neutral) on 1-TC chips.
    num_splits = 2 if (grid_b >= 2 and grid_b % 2 == 0) else 1
    inner = grid_b // num_splits

    # Split the Linear weight into row vectors -- no transpose, no concat.
    wo = weight[:, :ino]                               # (1, ino)
    wn = weight[:, ino:]                               # (1, inn)
    b = bias.reshape(1, 1).astype(jnp.float32)         # SMEM scalar

    kernel = functools.partial(
        summary_kernel, batch=B, tile_b=tile_b, inner=inner, ragged=ragged,
        use_mxu_for_acc=use_mxu_for_acc)

    acc, den = pl.pallas_call(
        kernel,
        out_shape=(jax.ShapeDtypeStruct((num_splits, inn), jnp.float32),
                   jax.ShapeDtypeStruct((num_splits, 1), jnp.float32)),
        grid=(num_splits, inner),
        in_specs=[
            pl.BlockSpec((1, 1), lambda c, i: (0, 0), memory_space=pltpu.SMEM),
            pl.BlockSpec((tile_b, ino), lambda c, i: (c * inner + i, 0)),
            pl.BlockSpec((tile_b, inn), lambda c, i: (c * inner + i, 0)),
            pl.BlockSpec((1, ino), lambda c, i: (0, 0)),
            pl.BlockSpec((1, inn), lambda c, i: (0, 0)),
        ],
        out_specs=(
            pl.BlockSpec((1, inn), lambda c, i: (c, 0)),
            pl.BlockSpec((1, 1), lambda c, i: (c, 0)),
        ),
        compiler_params=pltpu.CompilerParams(
            dimension_semantics=("parallel", "arbitrary"),
            vmem_limit_bytes=int(vmem_limit)),
    )(b, xo, xn, wo, wn)

    # Tiny cross-partition combine + softmax normalization (plain XLA ops).
    return (acc.sum(axis=0) / den.sum()).astype(xn.dtype)   # (inn,)


def summary_ref(xo, xn, weight, bias):
    """Pure-JAX (f32) reference mirroring the PyTorch module."""
    xcat = jnp.concatenate([xo, xn], axis=1).astype(jnp.float32)
    m = xcat @ weight.T.astype(jnp.float32) + bias.astype(jnp.float32)   # (B, 1)
    m = jnp.tanh(jnp.squeeze(m, axis=-1))                                # (B,)
    m = jnp.exp(m) / jnp.exp(m).sum()
    return m @ xn.astype(jnp.float32)                                    # (inn,)


if __name__ == "__main__":
    def make_inputs(key, B, ino, inn, dtype):
        k_xo, k_xn, k_w, k_b = jax.random.split(key, 4)
        xo = jax.random.normal(k_xo, (B, ino), dtype=jnp.float32).astype(dtype)
        xn = jax.random.normal(k_xn, (B, inn), dtype=jnp.float32).astype(dtype)
        fan_in = ino + inn
        bound = 1.0 / float(fan_in) ** 0.5     # nn.Linear-style U(-1/sqrt(f), +)
        weight = jax.random.uniform(k_w, (1, fan_in), minval=-bound, maxval=bound,
                                    dtype=jnp.float32)
        bias = jax.random.uniform(k_b, (1,), minval=-bound, maxval=bound,
                                  dtype=jnp.float32)
        return xo, xn, weight, bias

    ino, inn = 16, 32

    # Primary small-shape check (single full-batch tile).
    B = 8
    xo, xn, weight, bias = make_inputs(jax.random.PRNGKey(0), B, ino, inn,
                                       jnp.float32)
    out = jax.block_until_ready(summary_forward(xo, xn, weight, bias))
    ref = jax.block_until_ready(summary_ref(xo, xn, weight, bias))
    assert out.shape == (inn,), out.shape
    assert jnp.allclose(out, ref, atol=1e-5, rtol=1e-5), (out, ref)

    # Exercise the tiled / ragged / 2-way-split / dtype-aware-rounding paths.
    for B2, dtype, tol in ((44, jnp.float32, 1e-5), (20, jnp.bfloat16, 2e-2)):
        xo2, xn2, w2, b2 = make_inputs(jax.random.PRNGKey(1), B2, ino, inn, dtype)
        out2 = jax.block_until_ready(
            summary_forward(xo2, xn2, w2, b2, tile_b_cap=8))
        ref2 = jax.block_until_ready(summary_ref(xo2, xn2, w2, b2))
        assert out2.shape == (inn,), out2.shape
        assert jnp.allclose(out2.astype(jnp.float32), ref2, atol=tol, rtol=tol), (
            str(dtype), out2, ref2)

    print("KERNEL_OK")
</pallas_src>

<mosaic_0001>
module attributes {stable_mosaic.version = 11 : i64} {
  func.func @summary_kernel(%arg0: i32, %arg1: i32, %arg2: memref<1x1xf32, #tpu.memory_space<smem>>, %arg3: memref<8x16xf32, #tpu.memory_space<vmem>>, %arg4: memref<8x32xf32, #tpu.memory_space<vmem>>, %arg5: memref<1x16xf32, #tpu.memory_space<vmem>>, %arg6: memref<1x32xf32, #tpu.memory_space<vmem>>, %arg7: memref<1x32xf32, #tpu.memory_space<vmem>>, %arg8: memref<1x1xf32, #tpu.memory_space<vmem>>) attributes {dimension_semantics = [#tpu.dimension_semantics<parallel>, #tpu.dimension_semantics<arbitrary>], iteration_bounds = array<i64: 1, 1>, scalar_prefetch = 0 : i64, scratch_operands = 0 : i64, tpu.core_type = #tpu.core_type<tc>, window_params = [{transform_indices = @transform_0, window_bounds = array<i64: 1, 1>}, {transform_indices = @transform_1, window_bounds = array<i64: 8, 16>}, {transform_indices = @transform_2, window_bounds = array<i64: 8, 32>}, {pipeline_mode = #tpu.pipeline_mode<synchronous>, transform_indices = @transform_3, window_bounds = array<i64: 1, 16>}, {pipeline_mode = #tpu.pipeline_mode<synchronous>, transform_indices = @transform_4, window_bounds = array<i64: 1, 32>}, {transform_indices = @transform_5, window_bounds = array<i64: 1, 32>}, {transform_indices = @transform_6, window_bounds = array<i64: 1, 1>}]} {
    %c0_i32 = arith.constant 0 : i32
    %0 = arith.cmpi eq, %arg1, %c0_i32 : i32
    %1 = arith.extui %0 : i1 to i32
    %c0_i32_0 = arith.constant 0 : i32
    %2 = arith.cmpi ne, %1, %c0_i32_0 : i32
    scf.if %2 {
      %cst_21 = arith.constant 0.000000e+00 : f32
      %33 = vector.broadcast %cst_21 : f32 to vector<1x32xf32>
      %c0_22 = arith.constant 0 : index
      %c0_23 = arith.constant 0 : index
      %34 = vector.load %arg7[%c0_22, %c0_23] : memref<1x32xf32, #tpu.memory_space<vmem>>, vector<1x32xf32>
      tpu.vector_store %arg7[%c0_22, %c0_23], %33 {strides = array<i32>} : memref<1x32xf32, #tpu.memory_space<vmem>>, vector<1x32xf32>,
      %cst_24 = arith.constant 0.000000e+00 : f32
      %35 = vector.broadcast %cst_24 : f32 to vector<1x1xf32>
      %c0_25 = arith.constant 0 : index
      %c0_26 = arith.constant 0 : index
      %36 = vector.load %arg8[%c0_25, %c0_26] : memref<1x1xf32, #tpu.memory_space<vmem>>, vector<1x1xf32>
      tpu.vector_store %arg8[%c0_25, %c0_26], %35 {strides = array<i32>} : memref<1x1xf32, #tpu.memory_space<vmem>>, vector<1x1xf32>,
    } else {
    }
    %c0 = arith.constant 0 : index
    %c0_1 = arith.constant 0 : index
    %3 = vector.load %arg3[%c0, %c0_1] : memref<8x16xf32, #tpu.memory_space<vmem>>, vector<8x16xf32>
    %c0_2 = arith.constant 0 : index
    %c0_3 = arith.constant 0 : index
    %4 = vector.load %arg4[%c0_2, %c0_3] : memref<8x32xf32, #tpu.memory_space<vmem>>, vector<8x32xf32>
    %c0_4 = arith.constant 0 : index
    %c0_5 = arith.constant 0 : index
    %5 = vector.load %arg5[%c0_4, %c0_5] : memref<1x16xf32, #tpu.memory_space<vmem>>, vector<1x16xf32>
    %c0_6 = arith.constant 0 : index
    %c0_7 = arith.constant 0 : index
    %6 = vector.load %arg6[%c0_6, %c0_7] : memref<1x32xf32, #tpu.memory_space<vmem>>, vector<1x32xf32>
    %7 = vector.broadcast %5 : vector<1x16xf32> to vector<8x16xf32>
    %8 = arith.mulf %3, %7 : vector<8x16xf32>
    %cst = arith.constant dense<0.000000e+00> : vector<8xf32>
    %9 = vector.multi_reduction <add>, %8, %cst [1] : vector<8x16xf32> to vector<8xf32>
    %10 = vector.shape_cast %9 : vector<8xf32> to vector<8x1xf32>
    %11 = vector.broadcast %6 : vector<1x32xf32> to vector<8x32xf32>
    %12 = arith.mulf %4, %11 : vector<8x32xf32>
    %cst_8 = arith.constant dense<0.000000e+00> : vector<8xf32>
    %13 = vector.multi_reduction <add>, %12, %cst_8 [1] : vector<8x32xf32> to vector<8xf32>
    %14 = vector.shape_cast %13 : vector<8xf32> to vector<8x1xf32>
    %15 = arith.addf %10, %14 : vector<8x1xf32>
    %c0_9 = arith.constant 0 : index
    %c0_10 = arith.constant 0 : index
    %16 = memref.load %arg2[%c0_9, %c0_10] : memref<1x1xf32, #tpu.memory_space<smem>>
    %17 = vector.broadcast %16 : f32 to vector<8x1xf32>
    %18 = arith.addf %15, %17 : vector<8x1xf32>
    %19 = math.tanh %18 : vector<8x1xf32>
    %20 = math.exp %19 : vector<8x1xf32>
    %c0_11 = arith.constant 0 : index
    %c0_12 = arith.constant 0 : index
    %21 = vector.load %arg8[%c0_11, %c0_12] : memref<1x1xf32, #tpu.memory_space<vmem>>, vector<1x1xf32>
    %cst_13 = arith.constant dense<0.000000e+00> : vector<1xf32>
    %22 = vector.multi_reduction <add>, %20, %cst_13 [0] : vector<8x1xf32> to vector<1xf32>
    %23 = vector.shape_cast %22 : vector<1xf32> to vector<1x1xf32>
    %24 = arith.addf %21, %23 : vector<1x1xf32>
    %c0_14 = arith.constant 0 : index
    %c0_15 = arith.constant 0 : index
    %25 = vector.load %arg8[%c0_14, %c0_15] : memref<1x1xf32, #tpu.memory_space<vmem>>, vector<1x1xf32>
    tpu.vector_store %arg8[%c0_14, %c0_15], %24 {strides = array<i32>} : memref<1x1xf32, #tpu.memory_space<vmem>>, vector<1x1xf32>,
    %c0_16 = arith.constant 0 : index
    %c0_17 = arith.constant 0 : index
    %26 = vector.load %arg7[%c0_16, %c0_17] : memref<1x32xf32, #tpu.memory_space<vmem>>, vector<1x32xf32>
    %27 = vector.broadcast %20 : vector<8x1xf32> to vector<8x32xf32>
    %28 = arith.mulf %27, %4 : vector<8x32xf32>
    %cst_18 = arith.constant dense<0.000000e+00> : vector<32xf32>
    %29 = vector.multi_reduction <add>, %28, %cst_18 [0] : vector<8x32xf32> to vector<32xf32>
    %30 = vector.shape_cast %29 : vector<32xf32> to vector<1x32xf32>
    %31 = arith.addf %26, %30 : vector<1x32xf32>
    %c0_19 = arith.constant 0 : index
    %c0_20 = arith.constant 0 : index
    %32 = vector.load %arg7[%c0_19, %c0_20] : memref<1x32xf32, #tpu.memory_space<vmem>>, vector<1x32xf32>
    tpu.vector_store %arg7[%c0_19, %c0_20], %31 {strides = array<i32>} : memref<1x32xf32, #tpu.memory_space<vmem>>, vector<1x32xf32>,
    return
  }
  func.func @transform_0(%arg0: i32, %arg1: i32) -> (i32, i32) {
    %c0_i32 = arith.constant 0 : i32
    %c0_i32_0 = arith.constant 0 : i32
    %c0_i32_1 = arith.constant 0 : i32
    return %c0_i32, %c0_i32_0 : i32, i32
  }
  func.func @transform_1(%arg0: i32, %arg1: i32) -> (i32, i32) {
    %c1_i32 = arith.constant 1 : i32
    %0 = arith.muli %arg0, %c1_i32 : i32
    %1 = arith.addi %0, %arg1 : i32
    %c0_i32 = arith.constant 0 : i32
    %c0_i32_0 = arith.constant 0 : i32
    return %1, %c0_i32 : i32, i32
  }
  func.func @transform_2(%arg0: i32, %arg1: i32) -> (i32, i32) {
    %c1_i32 = arith.constant 1 : i32
    %0 = arith.muli %arg0, %c1_i32 : i32
    %1 = arith.addi %0, %arg1 : i32
    %c0_i32 = arith.constant 0 : i32
    %c0_i32_0 = arith.constant 0 : i32
    return %1, %c0_i32 : i32, i32
  }
  func.func @transform_3(%arg0: i32, %arg1: i32) -> (i32, i32) {
    %c0_i32 = arith.constant 0 : i32
    %c0_i32_0 = arith.constant 0 : i32
    %c0_i32_1 = arith.constant 0 : i32
    return %c0_i32, %c0_i32_0 : i32, i32
  }
  func.func @transform_4(%arg0: i32, %arg1: i32) -> (i32, i32) {
    %c0_i32 = arith.constant 0 : i32
    %c0_i32_0 = arith.constant 0 : i32
    %c0_i32_1 = arith.constant 0 : i32
    return %c0_i32, %c0_i32_0 : i32, i32
  }
  func.func @transform_5(%arg0: i32, %arg1: i32) -> (i32, i32) {
    %c0_i32 = arith.constant 0 : i32
    %c0_i32_0 = arith.constant 0 : i32
    return %arg0, %c0_i32 : i32, i32
  }
  func.func @transform_6(%arg0: i32, %arg1: i32) -> (i32, i32) {
    %c0_i32 = arith.constant 0 : i32
    %c0_i32_0 = arith.constant 0 : i32
    return %arg0, %c0_i32 : i32, i32
  }
}

</mosaic_0001>

<bundles_post_ra>
// kernel: tpu_custom_call.1
= control target key start
LH: loop header
LB: loop body
LE: loop exit
PB: predicated region body
PF: predicated region fallthrough
CT: control target
= control target key end

     0   :  { %13 = vsyncpa [#allocation4], 0  ;;  %s368_s0 = inlined_call_operand.<no memory space> [shape: f32[1,1], index: 0, kind: input, shape index: {}]   ;;  %s369_s1 = inlined_call_operand.hbm [shape: f32[8,16], index: 1, kind: input, shape index: {}]   ;;  %s370_s2 = inlined_call_operand.hbm [shape: f32[8,32], index: 2, kind: input, shape index: {}]   ;;  %s371_s3 = inlined_call_operand.vmem [shape: f32[1,16], index: 3, kind: input, shape index: {}]   ;;  %s372_s4 = inlined_call_operand.vmem [shape: f32[1,32], index: 4, kind: input, shape index: {}]   ;;  %s373_s5 = inlined_call_operand.hbm [shape: f32[1,32], index: 5, kind: output, shape index: {0}]   ;;  %s374_s6 = inlined_call_operand.hbm [shape: f32[1,1], index: 6, kind: output, shape index: {1}]  }
   0x1   :  { %14 = vsyncpa [#allocation7], 0 }
   0x2   :  { %15 = vsyncpa [#allocation5], 0 }
   0x3   :  { %16 = vsyncpa [#allocation10], 0  ;;  %s257_s21 = smov [#allocation3]   ;;  %s258_s23 = smov [#allocation6]  }
   0x4   :  { %s28_s22 = sshll.u32 %s257_s21, 4  ;;  %s41_s24 = sshll.u32 %s258_s23, 4  ;;  %s29_s22 = int_to_ptr.vmem [resolvable:$true] %s28_s22  ;;  %s42_s24 = int_to_ptr.vmem [resolvable:$true] %s41_s24 }
   0x5   :  { %s161_s27 = scalar_lea.hbm %s369_s1, 128 }
   0x6   :  { %p162_p0 = scmp.ne.s32.totalorder %s369_s1, %s161_s27  ;;  %p165_p1 = scmp.lt.u32.totalorder %s161_s27, %s369_s1 }
   0x8   :  { %p167_p2 = pnand %p165_p1, %p162_p0 }
   0xa   :  { %170 = shalt.err (!%p167_p2)
}
   0xb   :  { %s171_s8 = scalar_lea.vmem %s29_s22, 128  ;;  %p176_p4 = scmp.lt.s32.totalorder %s29_s22, %s29_s22 }
   0xc   :  { %p172_p3 = scmp.ne.s32.totalorder %s29_s22, %s171_s8  ;;  %p177_p5 = scmp.lt.s32.totalorder %s171_s8, %s171_s8 }
   0xe   :  { %p178_p6 = por %p177_p5, %p176_p4 }
  0x10   :  { %p179_p7 = pnand %p178_p6, %p172_p3 }
  0x12   :  { %182 = shalt.err (!%p179_p7)
}
  0x13   :  { %31 = dma.hbm_to_vmem [thread:$0]  %s369_s1, 128, %s29_s22, [#allocation4]  }
  0x14   :  { %s183_s13 = scalar_lea.hbm %s370_s2, 128 }
  0x15   :  { %p184_p8 = scmp.ne.s32.totalorder %s370_s2, %s183_s13  ;;  %p187_p9 = scmp.lt.u32.totalorder %s183_s13, %s370_s2 }
  0x17   :  { %p189_p10 = pnand %p187_p9, %p184_p8 }
  0x19   :  { %192 = shalt.err (!%p189_p10)
}
  0x1a   :  { %s193_s18 = scalar_lea.vmem %s42_s24, 128  ;;  %p198_p12 = scmp.lt.s32.totalorder %s42_s24, %s42_s24 }
  0x1b   :  { %p194_p11 = scmp.ne.s32.totalorder %s42_s24, %s193_s18  ;;  %p199_p13 = scmp.lt.s32.totalorder %s193_s18, %s193_s18 }
  0x1d   :  { %p200_p0 = por %p199_p13, %p198_p12 }
  0x1f   :  { %p201_p1 = pnand %p200_p0, %p194_p11 }
  0x21   :  { %204 = shalt.err (!%p201_p1)
}
  0x22   :  { %44 = dma.hbm_to_vmem [thread:$0]  %s370_s2, 128, %s42_s24, [#allocation7]  }
  0x23   :  { %249 = dma.done.wait [#allocation4], 128  }
  0x24   :  { %250 = vsyncadd [#allocation4], 4294967168 }
  0x25   :  { %251 = dma.done.wait [#allocation7], 128  }
  0x26   :  { %252 = vsyncadd [#allocation7], 4294967168  ;;  %v65_v0 = vld [vmem:[#allocation3] sm:$0xff]  ;;  %vm76_vm0 = vcmask 130048   ;;  %v66_v2 = vld [vmem:[#allocation6] sm:$0xff]  ;;  %vm87_vm1 = vcmask 261120   ;;  %v93_v10 = vstv %s368_s0 }
  0x27   :  { %v150_v1 = vld [vmem:[%s371_s3] ss:$0 sm:$0xff]  ;;  %vm61_vm2 = vcmask 253952   ;;  %v259_v8 = vmov 0.0   ;;  %vm63_vm3 = vcmask 0   ;;  %s260_s0 = smov [#allocation9]  }
  0x28   :  { %v75_v3 = vmul.f32 %v150_v1, %v65_v0  ;;  %v151_v4 = vld [vmem:[%s372_s4] ss:$0 sm:$0xff]  ;;  %62 = vst.msk [vmem:[#allocation8] sm:$0x1] %vm61_vm2, %v259_v8  ;;  %s136_s4 = sshll.u32 %s260_s0, 4  ;;  %s261_s24 = smov [#allocation8]   ;;  %s137_s4 = int_to_ptr.vmem [resolvable:$true] %s136_s4 }
  0x29   :  { %v86_v5 = vmul.f32 %v151_v4, %v66_v2  ;;  %64 = vst.msk [vmem:[#allocation9] sm:$0x1] %vm63_vm3, %v259_v8  ;;  %s126_s25 = sshll.u32 %s261_s24, 4  ;;  %s205_s26 = scalar_lea.vmem %s137_s4, 16  ;;  %s334_s25 = int_to_ptr.vmem [resolvable:$true] %s126_s25 }
  0x2a   :  { %v77_v6 = vsel %vm76_vm0, %v75_v3, 0.0  ;;  %p206_p2 = scmp.ne.s32.totalorder %s137_s4, %s205_s26  ;;  %s209_s27 = scalar_lea.vmem %s137_s4, 32 }
  0x2b   :  { %78 = vadd.xlane.f32.xlu0 %v77_v6  ;;  %v88_v7 = vsel %vm87_vm1, %v86_v5, 0.0  ;;  %p210_p3 = scmp.lt.s32.totalorder %s137_s4, %s137_s4  ;;  %p211_p4 = scmp.lt.s32.totalorder %s209_s27, %s205_s26 }
  0x2d   :  { %p212_p5 = por %p211_p4, %p210_p3 }
  0x2f   :  { %89 = vadd.xlane.f32.xlu0 %v88_v7  ;;  %v108_v31 = vld [vmem:[#allocation8] sm:$0x1]  ;;  %p213_p6 = pnand %p212_p5, %p206_p2 }
  0x30   :  { %v98_v28 = vld [vmem:[#allocation9] sm:$0x1] }
  0xb8   :  { %v79_v9 = vpop.xlane.xlu0 %78 }
  0xbc   :  { %v90_v11 = vpop.xlane.xlu0 %89 }
  0xbd   :  { %v91_v12 = vadd.f32 %v90_v11, %v79_v9 }
  0xbf   :  { %v94_v13 = vadd.f32 %v93_v10, %v91_v12 }
  0xc1   :  { %157 = vtanh.f32 %v94_v13 }
  0xcb   :  { %v158_v14 = vpop.eup %157 }
  0xcc   :  { %v96_v15 = vmul.f32 1.442695, %v158_v14 }
  0xce   :  { %159 = vpow2.f32 %v96_v15 }
  0xd8   :  { %v160_v16 = vpop.eup %159 }
  0xd9   :  { %v109_v17 = vmul.f32 %v160_v16, %v66_v2  ;;  %v99_v18 = vrot.slane %v160_v16, 4 }
  0xdb   :  { %v110_v19 = vsel %vm87_vm1, %v109_v17, 0.0  ;;  %v100_v20 = vadd.f32 %v160_v16, %v99_v18 }
  0xdc   :  { %v111_v21 = vrot.slane %v110_v19, 4 }
  0xdd   :  { %v101_v22 = vrot.slane %v100_v20, 2 }
  0xde   :  { %v112_v23 = vadd.f32 %v111_v21, %v110_v19 }
  0xdf   :  { %v102_v24 = vadd.f32 %v101_v22, %v100_v20 }
  0xe0   :  { %v113_v25 = vrot.slane %v112_v23, 2 }
  0xe1   :  { %v103_v26 = vrot.slane %v102_v24, 1 }
  0xe2   :  { %v114_v27 = vadd.f32 %v113_v25, %v112_v23 }
  0xe3   :  { %v104_v29 = vadd.f32 %v103_v26, %v102_v24 }
  0xe4   :  { %v115_v30 = vrot.slane %v114_v27, 1 }
  0xe5   :  { %v105_v32 = vadd.f32 %v104_v29, %v98_v28 }
  0xe6   :  { %v116_v33 = vadd.f32 %v115_v30, %v114_v27 }
  0xe7   :  { %107 = vst.msk [vmem:[#allocation9] sm:$0x1] %vm63_vm3, %v105_v32 }
  0xe8   :  { %v117_v34 = vadd.f32 %v116_v33, %v108_v31 }
  0xe9   :  { %216 = shalt.err (!%p213_p6)
}
  0xea   :  { %s217_s30 = scalar_lea.hbm %s374_s6, 16 }
  0xeb   :  { %p218_p7 = scmp.ne.s32.totalorder %s374_s6, %s217_s30  ;;  %p221_p8 = scmp.lt.u32.totalorder %s217_s30, %s374_s6 }
  0xed   :  { %p223_p9 = pnand %p221_p8, %p218_p7 }
  0xef   :  { %226 = shalt.err (!%p223_p9)
}
  0xf0   :  { %139 = dma.vmem_to_hbm [thread:$0]  %s137_s4, 16, %s374_s6, [#allocation10]   ;;  %119 = vst.msk [vmem:[#allocation8] sm:$0x1] %vm61_vm2, %v117_v34 }
  0xf1   :  { %s227_s13 = scalar_lea.vmem %s334_s25, 16  ;;  %s231_s14 = scalar_lea.vmem %s334_s25, 32 }
  0xf2   :  { %p228_p10 = scmp.ne.s32.totalorder %s334_s25, %s227_s13  ;;  %p232_p11 = scmp.lt.s32.totalorder %s334_s25, %s334_s25 }
  0xf3   :  { %p233_p12 = scmp.lt.s32.totalorder %s231_s14, %s227_s13 }
  0xf5   :  { %p234_p13 = por %p233_p12, %p232_p11 }
  0xf7   :  { %p235_p0 = pnand %p234_p13, %p228_p10 }
  0xf9   :  { %238 = shalt.err (!%p235_p0)
}
  0xfa   :  { %s239_s17 = scalar_lea.hbm %s373_s5, 16 }
  0xfb   :  { %p240_p1 = scmp.ne.s32.totalorder %s373_s5, %s239_s17  ;;  %p243_p2 = scmp.lt.u32.totalorder %s239_s17, %s373_s5 }
  0xfd   :  { %p245_p3 = pnand %p243_p2, %p240_p1 }
  0xff   :  { %248 = shalt.err (!%p245_p3)
}
 0x100   :  { %129 = dma.vmem_to_hbm [thread:$0]  %s334_s25, 16, %s373_s5, [#allocation5]  }
 0x101   :  { %253 = dma.done.wait [#allocation5], 16  }
 0x102   :  { %254 = vsyncadd [#allocation5], 4294967280 }
 0x103   :  { %255 = dma.done.wait [#allocation10], 16  }
 0x104   :  { %256 = vsyncadd [#allocation10], 4294967280 }
 0x105   :  { %146 = vsyncpa [#allocation4], 1 }
 0x106   :  { %147 = vsyncpa [#allocation7], 1 }
 0x107   :  { %148 = vsyncpa [#allocation5], 1 }
 0x108   :  { %149 = vsyncpa [#allocation10], 1 }

</bundles_post_ra>
